<compile_context>
chip_gen: v7x
topology: tpu7x:2x2x1
jax: 0.10.0
libtpu: 0.0.40
codegen_flags: <defaults>
</compile_context>

<pallas_src>
import jax
import jax.numpy as jnp
from jax.experimental import pallas as pl
from jax.experimental.pallas import tpu as pltpu

HIDDEN = 8      # fixed by the module definition
LANE = 128      # TPU lane width
SUB = 8         # TPU sublane width


def _round_up(v, m):
    return ((v + m - 1) // m) * m


def make_mlp_kernel(obs_rows, lane, n_acs):
    # Static row offsets inside the packed parameter slab (all sublane-aligned).
    w1_r0 = 0
    w2_r0 = obs_rows
    w3_r0 = obs_rows + lane
    b1_r0 = obs_rows + 2 * lane
    b2_r0 = b1_r0 + SUB
    b3_r0 = b2_r0 + SUB

    def mlp_kernel(x_ref, p_ref, o_ref):
        x = x_ref[...]                                   # (tile_b, obs_rows)

        w1 = p_ref[w1_r0:w1_r0 + obs_rows, :]            # (obs_rows, lane)
        w2 = p_ref[w2_r0:w2_r0 + lane, :]                # (lane, lane)
        w3 = p_ref[w3_r0:w3_r0 + lane, :]                # (lane, lane)
        b1 = p_ref[b1_r0:b1_r0 + 1, :]                   # (1, lane)
        b2 = p_ref[b2_r0:b2_r0 + 1, :]
        b3 = p_ref[b3_r0:b3_r0 + 1, :]                   # padded cols carry -1e30

        h1 = jnp.maximum(jnp.dot(x, w1, preferred_element_type=jnp.float32) + b1, 0.0)
        h2 = jnp.maximum(jnp.dot(h1, w2, preferred_element_type=jnp.float32) + b2, 0.0)
        logits = jnp.dot(h2, w3, preferred_element_type=jnp.float32) + b3

        # Numerically stable softmax over the lane-padded last axis.
        # Padded logit columns carry a -1e30 bias -> exp underflows to exactly 0,
        # so they contribute nothing to max or sum.
        m = jnp.max(logits, axis=-1, keepdims=True)
        e = jnp.exp(logits - m)
        denom = jnp.sum(e, axis=-1, keepdims=True)
        # Exact divide (correctness): only the first n_acs columns are stored,
        # so the HBM write is n_acs-wide, not 128-wide.
        o_ref[...] = e[:, :n_acs] / denom

    return mlp_kernel


def mlp_forward(x, params, *, tile_b_max=2048):
    """x: (B, n_obs) float32. params: w1,b1,w2,b2,w3,b3 with weights as (in, out)."""
    w1, b1 = params["w1"], params["b1"]
    w2, b2 = params["w2"], params["b2"]
    w3, b3 = params["w3"], params["b3"]

    B, n_obs = x.shape
    n_acs = w3.shape[1]

    obs_rows = _round_up(max(n_obs, 1), SUB)             # sublane-aligned input width
    lane = _round_up(max(n_acs, HIDDEN), LANE)           # shared padded hidden/logit width

    # ---- pack all parameters into one lane-dense, VMEM-resident slab (one DMA) ----
    def pad2(a, rows, cols):
        out = jnp.zeros((rows, cols), jnp.float32)
        return out.at[: a.shape[0], : a.shape[1]].set(a.astype(jnp.float32))

    w1_p = pad2(w1, obs_rows, lane)
    w2_p = pad2(w2, lane, lane)
    w3_p = pad2(w3, lane, lane)
    b1_p = pad2(b1.reshape(1, -1), SUB, lane)
    b2_p = pad2(b2.reshape(1, -1), SUB, lane)
    # Padded logit columns get a huge negative bias so softmax ignores them exactly.
    b3_row = jnp.full((1, lane), -1e30, jnp.float32)
    b3_row = b3_row.at[:, :n_acs].set(b3.reshape(1, -1).astype(jnp.float32))
    b3_p = jnp.zeros((SUB, lane), jnp.float32).at[0:1, :].set(b3_row)

    slab = jnp.concatenate([w1_p, w2_p, w3_p, b1_p, b2_p, b3_p], axis=0)

    # ---- batch tiling: stream x / out tiles, keep params resident ----
    b_pad8 = _round_up(max(B, 1), SUB)
    tile_b = min(tile_b_max, b_pad8)
    # v7x: if the whole batch fits in one tile, split it so both TensorCores get work.
    if tile_b == b_pad8 and b_pad8 > 2 * SUB:
        tile_b = _round_up(pl.cdiv(b_pad8, 2), SUB)
    num_tiles = pl.cdiv(b_pad8, tile_b)                  # ragged last tile is edge-masked

    if B == b_pad8 and n_obs == obs_rows:
        x_p = x.astype(jnp.float32)                      # no wrapper-side pad pass
    else:
        x_p = jnp.zeros((b_pad8, obs_rows), jnp.float32).at[:B, :n_obs].set(
            x.astype(jnp.float32))

    kernel = make_mlp_kernel(obs_rows, lane, n_acs)
    out_p = pl.pallas_call(
        kernel,
        out_shape=jax.ShapeDtypeStruct((b_pad8, n_acs), jnp.float32),
        grid=(num_tiles,),
        in_specs=[
            pl.BlockSpec((tile_b, obs_rows), lambda i: (i, 0)),   # streamed x tile
            pl.BlockSpec(slab.shape, lambda i: (0, 0)),           # constant -> resident
        ],
        out_specs=pl.BlockSpec((tile_b, n_acs), lambda i: (i, 0)),  # narrow output block
        compiler_params=pltpu.CompilerParams(
            dimension_semantics=("parallel",),        # shard batch grid across TCs (v7x)
            vmem_limit_bytes=32 * 1024 * 1024,
        ),
    )(x_p, slab)

    return out_p if B == b_pad8 else out_p[:B]


def init_params(key, n_obs, n_acs):
    """Deterministic init mimicking PyTorch Linear default (uniform +/-1/sqrt(fan_in)).
    Weights stored transposed: (in_features, out_features). Biases stored as (1, out)."""
    ks = jax.random.split(key, 6)

    def linear(kw, kb, fan_in, fan_out):
        bound = 1.0 / jnp.sqrt(fan_in)
        w = jax.random.uniform(kw, (fan_in, fan_out), jnp.float32, -bound, bound)
        b = jax.random.uniform(kb, (1, fan_out), jnp.float32, -bound, bound)
        return w, b

    w1, b1 = linear(ks[0], ks[1], n_obs, HIDDEN)
    w2, b2 = linear(ks[2], ks[3], HIDDEN, HIDDEN)
    w3, b3 = linear(ks[4], ks[5], HIDDEN, n_acs)
    return {"w1": w1, "b1": b1, "w2": w2, "b2": b2, "w3": w3, "b3": b3}


def mlp_reference(x, params):
    h1 = jax.nn.relu(x @ params["w1"] + params["b1"])
    h2 = jax.nn.relu(h1 @ params["w2"] + params["b2"])
    return jax.nn.softmax(h2 @ params["w3"] + params["b3"], axis=-1)


if __name__ == "__main__":
    key = jax.random.PRNGKey(0)
    n_obs, n_acs, batch = 16, 4, 8

    kx, kp = jax.random.split(key)
    x = jax.random.normal(kx, (batch, n_obs), jnp.float32)
    params = init_params(kp, n_obs, n_acs)

    out = mlp_forward(x, params)
    out = jax.block_until_ready(out)

    ref = mlp_reference(x, params)
    assert out.shape == (batch, n_acs)
    # Tolerance accommodates XLA:TPU's default reduced-precision (bf16-pass) f32
    # matmuls, which the in-kernel MXU dots may or may not share pass-for-pass.
    assert jnp.allclose(out, ref, atol=2e-3, rtol=2e-3), "mismatch vs JAX reference"
    # Exact divide -> each row is exactly normalized (up to f32 rounding).
    assert jnp.allclose(jnp.sum(out, axis=-1), 1.0, atol=1e-4)

    print("KERNEL_OK")
</pallas_src>

<mosaic_0001>
module attributes {stable_mosaic.version = 11 : i64} {
  func.func @mlp_kernel(%arg0: i32, %arg1: memref<8x16xf32, #tpu.memory_space<vmem>>, %arg2: memref<296x128xf32, #tpu.memory_space<vmem>>, %arg3: memref<8x4xf32, #tpu.memory_space<vmem>>) attributes {dimension_semantics = [#tpu.dimension_semantics<parallel>], iteration_bounds = array<i64: 1>, scalar_prefetch = 0 : i64, scratch_operands = 0 : i64, tpu.core_type = #tpu.core_type<tc>, window_params = [{transform_indices = @transform_0, window_bounds = array<i64: 8, 16>}, {pipeline_mode = #tpu.pipeline_mode<synchronous>, transform_indices = @transform_1, window_bounds = array<i64: 296, 128>}, {transform_indices = @transform_2, window_bounds = array<i64: 8, 4>}]} {
    %c0 = arith.constant 0 : index
    %c0_0 = arith.constant 0 : index
    %0 = vector.load %arg1[%c0, %c0_0] : memref<8x16xf32, #tpu.memory_space<vmem>>, vector<8x16xf32>
    %c0_1 = arith.constant 0 : index
    %c0_2 = arith.constant 0 : index
    %1 = vector.load %arg2[%c0_1, %c0_2] : memref<296x128xf32, #tpu.memory_space<vmem>>, vector<16x128xf32>
    %c16 = arith.constant 16 : index
    %c0_3 = arith.constant 0 : index
    %2 = vector.load %arg2[%c16, %c0_3] : memref<296x128xf32, #tpu.memory_space<vmem>>, vector<128x128xf32>
    %c144 = arith.constant 144 : index
    %c0_4 = arith.constant 0 : index
    %3 = vector.load %arg2[%c144, %c0_4] : memref<296x128xf32, #tpu.memory_space<vmem>>, vector<128x128xf32>
    %c272 = arith.constant 272 : index
    %c0_5 = arith.constant 0 : index
    %4 = vector.load %arg2[%c272, %c0_5] : memref<296x128xf32, #tpu.memory_space<vmem>>, vector<1x128xf32>
    %c280 = arith.constant 280 : index
    %c0_6 = arith.constant 0 : index
    %5 = vector.load %arg2[%c280, %c0_6] : memref<296x128xf32, #tpu.memory_space<vmem>>, vector<1x128xf32>
    %c288 = arith.constant 288 : index
    %c0_7 = arith.constant 0 : index
    %6 = vector.load %arg2[%c288, %c0_7] : memref<296x128xf32, #tpu.memory_space<vmem>>, vector<1x128xf32>
    %cst = arith.constant dense<0.000000e+00> : vector<8x128xf32>
    %7 = tpu.matmul %0, %1, %cst {dimension_numbers = #tpu.dot_dimension_numbers<[1], [0], [0], [1], [0, 0, 1, 1], [], []>} : vector<8x16xf32>, vector<16x128xf32>, vector<8x128xf32> -> vector<8x128xf32>
    %8 = vector.broadcast %4 : vector<1x128xf32> to vector<8x128xf32>
    %9 = arith.addf %7, %8 : vector<8x128xf32>
    %cst_8 = arith.constant 0.000000e+00 : f32
    %10 = vector.broadcast %cst_8 : f32 to vector<8x128xf32>
    %11 = arith.maximumf %9, %10 : vector<8x128xf32>
    %cst_9 = arith.constant dense<0.000000e+00> : vector<8x128xf32>
    %12 = tpu.matmul %11, %2, %cst_9 {dimension_numbers = #tpu.dot_dimension_numbers<[1], [0], [0], [1], [0, 0, 1, 1], [], []>} : vector<8x128xf32>, vector<128x128xf32>, vector<8x128xf32> -> vector<8x128xf32>
    %13 = vector.broadcast %5 : vector<1x128xf32> to vector<8x128xf32>
    %14 = arith.addf %12, %13 : vector<8x128xf32>
    %cst_10 = arith.constant 0.000000e+00 : f32
    %15 = vector.broadcast %cst_10 : f32 to vector<8x128xf32>
    %16 = arith.maximumf %14, %15 : vector<8x128xf32>
    %cst_11 = arith.constant dense<0.000000e+00> : vector<8x128xf32>
    %17 = tpu.matmul %16, %3, %cst_11 {dimension_numbers = #tpu.dot_dimension_numbers<[1], [0], [0], [1], [0, 0, 1, 1], [], []>} : vector<8x128xf32>, vector<128x128xf32>, vector<8x128xf32> -> vector<8x128xf32>
    %18 = vector.broadcast %6 : vector<1x128xf32> to vector<8x128xf32>
    %19 = arith.addf %17, %18 : vector<8x128xf32>
    %cst_12 = arith.constant dense<0xFF800000> : vector<8xf32>
    %20 = vector.multi_reduction <maximumf>, %19, %cst_12 [1] : vector<8x128xf32> to vector<8xf32>
    %21 = vector.shape_cast %20 : vector<8xf32> to vector<8x1xf32>
    %22 = vector.broadcast %21 : vector<8x1xf32> to vector<8x128xf32>
    %23 = arith.subf %19, %22 : vector<8x128xf32>
    %24 = math.exp %23 : vector<8x128xf32>
    %cst_13 = arith.constant dense<0.000000e+00> : vector<8xf32>
    %25 = vector.multi_reduction <add>, %24, %cst_13 [1] : vector<8x128xf32> to vector<8xf32>
    %26 = vector.shape_cast %25 : vector<8xf32> to vector<8x1xf32>
    %27 = vector.extract_strided_slice %24 {offsets = [0, 0], sizes = [8, 4], strides = [1, 1]} : vector<8x128xf32> to vector<8x4xf32>
    %28 = vector.broadcast %26 : vector<8x1xf32> to vector<8x4xf32>
    %29 = arith.divf %27, %28 : vector<8x4xf32>
    %c0_14 = arith.constant 0 : index
    %c0_15 = arith.constant 0 : index
    %30 = vector.load %arg3[%c0_14, %c0_15] : memref<8x4xf32, #tpu.memory_space<vmem>>, vector<8x4xf32>
    tpu.vector_store %arg3[%c0_14, %c0_15], %29 {strides = array<i32>} : memref<8x4xf32, #tpu.memory_space<vmem>>, vector<8x4xf32>,
    return
  }
  func.func @transform_0(%arg0: i32) -> (i32, i32) {
    %c0_i32 = arith.constant 0 : i32
    %c0_i32_0 = arith.constant 0 : i32
    return %arg0, %c0_i32 : i32, i32
  }
  func.func @transform_1(%arg0: i32) -> (i32, i32) {
    %c0_i32 = arith.constant 0 : i32
    %c0_i32_0 = arith.constant 0 : i32
    %c0_i32_1 = arith.constant 0 : i32
    return %c0_i32, %c0_i32_0 : i32, i32
  }
  func.func @transform_2(%arg0: i32) -> (i32, i32) {
    %c0_i32 = arith.constant 0 : i32
    %c0_i32_0 = arith.constant 0 : i32
    return %arg0, %c0_i32 : i32, i32
  }
}

</mosaic_0001>

<bundles_post_ra>
// kernel: tpu_custom_call.1
= control target key start
LH: loop header
LB: loop body
LE: loop exit
PB: predicated region body
PF: predicated region fallthrough
CT: control target
= control target key end

     0   :  { %7 = vsyncpa [#allocation3], 0  ;;  %s624_s0 = inlined_call_operand.hbm [shape: f32[8,16], index: 0, kind: input, shape index: {}]   ;;  %s625_s1 = inlined_call_operand.hbm [shape: f32[296,128], index: 1, kind: input, shape index: {}]   ;;  %s626_s2 = inlined_call_operand.vmem [shape: f32[8,4], index: 2, kind: output, shape index: {}]  }
   0x1   :  { %8 = vsyncpa [#allocation5], 0  ;;  %s548_s9 = smov [#allocation2]   ;;  %s549_s11 = smov [#allocation4]  }
   0x2   :  { %s15_s10 = sshll.u32 %s548_s9, 4  ;;  %s24_s12 = sshll.u32 %s549_s11, 4  ;;  %s16_s10 = int_to_ptr.vmem [resolvable:$true] %s15_s10  ;;  %s570_s12 = int_to_ptr.vmem [resolvable:$true] %s24_s12 }
   0x3   :  { %s500_s15 = scalar_lea.hbm %s624_s0, 128 }
   0x4   :  { %p501_p0 = scmp.ne.s32.totalorder %s624_s0, %s500_s15  ;;  %p504_p1 = scmp.lt.u32.totalorder %s500_s15, %s624_s0 }
   0x6   :  { %p506_p2 = pnand %p504_p1, %p501_p0 }
   0x8   :  { %509 = shalt.err (!%p506_p2)
}
   0x9   :  { %s510_s20 = scalar_lea.vmem %s16_s10, 128  ;;  %p515_p4 = scmp.lt.s32.totalorder %s16_s10, %s16_s10 }
   0xa   :  { %p511_p3 = scmp.ne.s32.totalorder %s16_s10, %s510_s20  ;;  %p516_p5 = scmp.lt.s32.totalorder %s510_s20, %s510_s20 }
   0xc   :  { %p517_p6 = por %p516_p5, %p515_p4 }
   0xe   :  { %p518_p7 = pnand %p517_p6, %p511_p3 }
  0x10   :  { %521 = shalt.err (!%p518_p7)
}
  0x11   :  { %18 = dma.hbm_to_vmem [thread:$0]  %s624_s0, 128, %s16_s10, [#allocation3]  }
  0x12   :  { %s522_s25 = scalar_lea.hbm %s625_s1, 4736 }
  0x13   :  { %p523_p8 = scmp.ne.s32.totalorder %s625_s1, %s522_s25  ;;  %p526_p9 = scmp.lt.u32.totalorder %s522_s25, %s625_s1 }
  0x15   :  { %p528_p10 = pnand %p526_p9, %p523_p8 }
  0x17   :  { %531 = shalt.err (!%p528_p10)
}
  0x18   :  { %s532_s30 = scalar_lea.vmem %s570_s12, 4736  ;;  %p537_p12 = scmp.lt.s32.totalorder %s570_s12, %s570_s12 }
  0x19   :  { %p533_p11 = scmp.ne.s32.totalorder %s570_s12, %s532_s30  ;;  %p538_p13 = scmp.lt.s32.totalorder %s532_s30, %s532_s30 }
  0x1b   :  { %p539_p0 = por %p538_p13, %p537_p12 }
  0x1d   :  { %p540_p1 = pnand %p539_p0, %p533_p11 }
  0x1f   :  { %543 = shalt.err (!%p540_p1)
}
  0x20   :  { %s550_s0 = smov 128   ;;  %s551_s3 = smov 8  }
  0x21   :  { %30 = dma.hbm_to_vmem [thread:$0]  %s625_s1, 4736, %s570_s12, [#allocation5], %s550_s0, %s550_s0, %s551_s3  }
  0x22   :  { %544 = dma.done.wait [#allocation3], 128  }
  0x23   :  { %545 = vsyncadd [#allocation3], 4294967168 }
  0x24   :  { %546 = dma.done.wait [#allocation5], 4736  }
  0x25   :  { %547 = vsyncadd [#allocation5], 4294962560  ;;  %v552_v0 = vmov 0.0|0.0   ;;  %vm553_vm0 = vmmov 0   ;;  %v554_v1 = vmov 0.0   ;;  %v38_v2 = vld [vmem:[#allocation4] sm:$0xff] }
  0x26   :  { %438 = vmatprep.subr.bf16.mxu0 %v552_v0  ;;  %365 = vmatprep.mubr.msk.f32.mxu0 %vm553_vm0, %v554_v1  ;;  %v39_v3 = vld [vmem:[#allocation4 + $0x8] sm:$0xff]  ;;  %v40_v5 = vld [vmem:[#allocation4 + $0x10] sm:$0xff]  ;;  %v41_v6 = vld [vmem:[#allocation4 + $0x18] sm:$0xff]  ;;  %vm79_vm1 = vcmask 130048   ;;  %vm312_vm2 = vcmask 31744  }
  0x27   :  { %441 = vmatprep.subr.bf16.mxu1 %v552_v0  ;;  %400 = vmatprep.mubr.msk.f32.mxu1 %vm553_vm0, %v554_v1  ;;  %v439_v4 = vpack.c.bf16 %v39_v3, %v38_v2  ;;  %v42_v7 = vld [vmem:[#allocation4 + $0x20] sm:$0xff]  ;;  %v442_v8 = vpack.c.bf16 %v41_v6, %v40_v5  ;;  %v43_v9 = vld [vmem:[#allocation4 + $0x28] sm:$0xff]  ;;  %v37_v10 = vld [vmem:[#allocation2] sm:$0xff] }
  0x28   :  { %v445_v11 = vpack.c.bf16 %v43_v9, %v42_v7  ;;  %v44_v12 = vld [vmem:[#allocation4 + $0x30] sm:$0xff]  ;;  %v45_v13 = vld [vmem:[#allocation4 + $0x38] sm:$0xff]  ;;  %v46_v15 = vld [vmem:[#allocation4 + $0x40] sm:$0xff] }
  0x29   :  { %440 = vmatpush3.bf16.msra.mxu0 %v439_v4  ;;  %443 = vmatpush3.bf16.msra.mxu1 %v442_v8  ;;  %v448_v14 = vpack.c.bf16 %v45_v13, %v44_v12  ;;  %v47_v16 = vld [vmem:[#allocation4 + $0x48] sm:$0xff]  ;;  %v48_v18 = vld [vmem:[#allocation4 + $0x50] sm:$0xff]  ;;  %v49_v19 = vld [vmem:[#allocation4 + $0x58] sm:$0xff] }
  0x2a   :  { %465 = vmatprep.subr.bf16.mxu0 %v552_v0  ;;  %444 = vmatprep.subr.bf16.mxu1 %v552_v0  ;;  %v451_v17 = vpack.c.bf16 %v47_v16, %v46_v15  ;;  %v454_v20 = vpack.c.bf16 %v49_v19, %v48_v18  ;;  %v50_v21 = vld [vmem:[#allocation4 + $0x60] sm:$0xff]  ;;  %v51_v22 = vld [vmem:[#allocation4 + $0x68] sm:$0xff]  ;;  %v52_v24 = vld [vmem:[#allocation4 + $0x70] sm:$0xff] }
  0x2b   :  { %v457_v23 = vpack.c.bf16 %v51_v22, %v50_v21  ;;  %v53_v25 = vld [vmem:[#allocation4 + $0x78] sm:$0xff]  ;;  %v54_v27 = vld [vmem:[#allocation4 + $0x80] sm:$0xff]  ;;  %v55_v28 = vld [vmem:[#allocation4 + $0x88] sm:$0xff] }
  0x2c   :  { %366 = vmatmul.mubr.msk.f32.vlgmr.msra.gmra.mrb[0].mxu0 %vm79_vm1, %v37_v10  ;;  %v460_v26 = vpack.c.bf16 %v53_v25, %v52_v24  ;;  %v463_v29 = vpack.c.bf16 %v55_v28, %v54_v27  ;;  %v56_v30 = vld [vmem:[#allocation4 + $0x90] sm:$0xff]  ;;  %v57_v31 = vld [vmem:[#allocation4 + $0x98] sm:$0xff]  ;;  %v58_v32 = vld [vmem:[#allocation4 + $0xa0] sm:$0xff] }
  0x2d   :  { %435 = vmatprep.mubr.msk.f32.mxu0 %vm553_vm0, %v554_v1  ;;  %446 = vmatpush3.bf16.msra.mxu1 %v445_v11  ;;  %v466_v33 = vpack.c.bf16 %v57_v31, %v56_v30  ;;  %v59_v34 = vld [vmem:[#allocation4 + $0xa8] sm:$0xff]  ;;  %v60_v36 = vld [vmem:[#allocation4 + $0xb0] sm:$0xff]  ;;  %v61_v37 = vld [vmem:[#allocation4 + $0xb8] sm:$0xff] }
  0x2e   :  { %447 = vmatprep.subr.bf16.mxu1 %v552_v0  ;;  %v469_v35 = vpack.c.bf16 %v59_v34, %v58_v32  ;;  %v472_v38 = vpack.c.bf16 %v61_v37, %v60_v36  ;;  %v62_v39 = vld [vmem:[#allocation4 + $0xc0] sm:$0xff]  ;;  %v63_v40 = vld [vmem:[#allocation4 + $0xc8] sm:$0xff]  ;;  %v64_v42 = vld [vmem:[#allocation4 + $0xd0] sm:$0xff] }
  0x2f   :  { %467 = vmatpush3.bf16.msra.mxu0 %v466_v33  ;;  %v475_v41 = vpack.c.bf16 %v63_v40, %v62_v39  ;;  %v65_v43 = vld [vmem:[#allocation4 + $0xd8] sm:$0xff]  ;;  %v66_v45 = vld [vmem:[#allocation4 + $0xe0] sm:$0xff]  ;;  %v67_v46 = vld [vmem:[#allocation4 + $0xe8] sm:$0xff] }
  0x30   :  { %468 = vmatprep.subr.bf16.mxu0 %v552_v0  ;;  %v478_v44 = vpack.c.bf16 %v65_v43, %v64_v42  ;;  %v481_v47 = vpack.c.bf16 %v67_v46, %v66_v45  ;;  %v68_v48 = vld [vmem:[#allocation4 + $0xf0] sm:$0xff]  ;;  %v69_v49 = vld [vmem:[#allocation4 + $0xf8] sm:$0xff]  ;;  %v70_v56 = vld [vmem:[#allocation4 + $0x100] sm:$0xff] }
  0x31   :  { %449 = vmatpush3.bf16.msra.mxu1 %v448_v14  ;;  %v484_v50 = vpack.c.bf16 %v69_v49, %v68_v48  ;;  %v320_v51 = vld [vmem:[#allocation4 + $0x110] ss:$0 sm:$0xff]  ;;  %v71_v57 = vld [vmem:[#allocation4 + $0x108] sm:$0xff]  ;;  %v322_v59 = vld [vmem:[#allocation4 + $0x118] ss:$0 sm:$0xff] }
  0x32   :  { %450 = vmatprep.subr.bf16.mxu1 %v552_v0  ;;  %v487_v58 = vpack.c.bf16 %v71_v57, %v70_v56  ;;  %v323_v1 = vld [vmem:[#allocation4 + $0x120] ss:$0 sm:$0xff] }
  0x33   :  { %470 = vmatpush3.bf16.msra.mxu0 %v469_v35 }
  0x34   :  { %471 = vmatprep.subr.bf16.mxu0 %v552_v0 }
  0x35   :  { %452 = vmatpush3.bf16.msra.mxu1 %v451_v17 }
  0x36   :  { %453 = vmatprep.subr.bf16.mxu1 %v552_v0 }
  0x37   :  { %473 = vmatpush3.bf16.msra.mxu0 %v472_v38 }
  0x38   :  { %474 = vmatprep.subr.bf16.mxu0 %v552_v0 }
  0x39   :  { %455 = vmatpush3.bf16.msra.mxu1 %v454_v20 }
  0x3a   :  { %456 = vmatprep.subr.bf16.mxu1 %v552_v0 }
  0x3b   :  { %476 = vmatpush3.bf16.msra.mxu0 %v475_v41 }
  0x3c   :  { %477 = vmatprep.subr.bf16.mxu0 %v552_v0 }
  0x3d   :  { %458 = vmatpush3.bf16.msra.mxu1 %v457_v23 }
  0x3e   :  { %459 = vmatprep.subr.bf16.mxu1 %v552_v0 }
  0x3f   :  { %479 = vmatpush3.bf16.msra.mxu0 %v478_v44 }
  0x40   :  { %480 = vmatprep.subr.bf16.mxu0 %v552_v0 }
  0x41   :  { %461 = vmatpush3.bf16.msra.mxu1 %v460_v26 }
  0x42   :  { %462 = vmatprep.subr.bf16.mxu1 %v552_v0 }
  0x43   :  { %482 = vmatpush3.bf16.msra.mxu0 %v481_v47 }
  0x44   :  { %483 = vmatprep.subr.bf16.mxu0 %v552_v0 }
  0x45   :  { %464 = vmatpush3.bf16.msra.mxu1 %v463_v29 }
  0x47   :  { %485 = vmatpush3.bf16.msra.mxu0 %v484_v50 }
  0x48   :  { %486 = vmatprep.subr.bf16.mxu0 %v552_v0 }
  0x4b   :  { %488 = vmatpush3.bf16.msra.mxu0 %v487_v58 }
  0xff   :  { %v149_v52 = vpop.f32.mrb[0].mxu0 }
 0x100   :  { %v150_v53 = vadd.f32 %v320_v51, %v149_v52  ;;  %v367_v54 = vpop.f32.mrb[1].mxu0 }
 0x102   :  { %v153_v55 = vmax.f32 %v150_v53, 0.0 }
 0x104   :  { %401 = vmatmul.mubr.f32.vlgmr.msra.gmra.mrb[0].mxu1 %v153_v55 }
 0x1d7   :  { %v224_v60 = vpop.f32.mrb[0].mxu1 }
 0x1d8   :  { %v225_v61 = vadd.f32 %v322_v59, %v224_v60  ;;  %v402_v62 = vpop.f32.mrb[1].mxu1 }
 0x1da   :  { %v228_v63 = vmax.f32 %v225_v61, 0.0 }
 0x1dc   :  { %436 = vmatmul.mubr.f32.vlgmr.msra.gmra.mrb[2].mxu0 %v228_v63 }
 0x2af   :  { %v299_v2 = vpop.f32.mrb[2].mxu0 }
 0x2b0   :  { %v300_v3 = vadd.f32 %v323_v1, %v299_v2  ;;  %v437_v0 = vpop.f32.mrb[3].mxu0 }
 0x2b2   :  { %303 = vmax.xlane.f32.xlu0 %v300_v3 }
 0x33f   :  { %v304_v4 = vpop.xlane.xlu0 %303 }
 0x340   :  { %v305_v5 = vsub.f32 %v300_v3, %v304_v4 }
 0x342   :  { %v306_v6 = vmul.f32 1.442695, %v305_v5 }
 0x344   :  { %496 = vpow2.f32 %v306_v6 }
 0x34e   :  { %v497_v7 = vpop.eup %496 }
 0x34f   :  { %308 = vadd.xlane.f32.xlu0 %v497_v7 }
 0x3dc   :  { %v309_v8 = vpop.xlane.xlu0 %308 }
 0x3dd   :  { %498 = vrcp.f32 %v309_v8 }
 0x3e7   :  { %v499_v9 = vpop.eup %498 }
 0x3e8   :  { %v311_v10 = vmul.f32 %v499_v9, %v497_v7 }
 0x3ea   :  { %313 = vst.msk [vmem:[%s626_s2] sm:$0xff] %vm312_vm2, %v311_v10 }
 0x3eb   :  { %318 = vsyncpa [#allocation3], 1 }
 0x3ec   :  { %319 = vsyncpa [#allocation5], 1 }

</bundles_post_ra>
